<compile_context>
chip_gen: v6e
topology: v6e:2x2x1
jax: 0.10.0
libtpu: 0.0.40
codegen_flags: <defaults>
</compile_context>

<pallas_src>
import jax
import jax.numpy as jnp
from jax.experimental import pallas as pl
from jax.experimental.pallas import tpu as pltpu


def _derivnet3d_kernel(x_ref, w1_ref, b1_ref, w2_ref, b2_ref,
                       w3_ref, b3_ref, w4_ref, b4_ref, out_ref):
    f32 = jnp.float32
    x = x_ref[...]            # (3, T)     -- batch on lanes
    w1 = w1_ref[...]          # (n_h1, 3)  (torch layout: out x in)
    w2 = w2_ref[...]          # (n_h2, n_h1)
    w3 = w3_ref[...]          # (n_h3, n_h2)
    w4 = w4_ref[...]          # (n_o,  n_h3)
    b1 = b1_ref[...]          # (n_h1, 1)
    b2 = b2_ref[...]          # (n_h2, 1)
    b3 = b3_ref[...]          # (n_h3, 1)
    b4 = b4_ref[...]          # (n_o,  1)

    T = x.shape[1]

    # ---- layer 1: K=3 -> three VPU broadcast MACs (no wasted MXU pass) ----
    h1 = (w1[:, 0:1] * x[0:1, :] + w1[:, 1:2] * x[1:2, :]
          + w1[:, 2:3] * x[2:3, :] + b1)                       # (n_h1, T)
    z1 = jnp.tanh(h1)
    d1 = 1.0 - z1 * z1                                         # tanh' = sech^2

    # Fused RHS: [forward | 3 Jacobian columns] stacked along the lane axis.
    r1 = jnp.concatenate(
        [z1, d1 * w1[:, 0:1], d1 * w1[:, 1:2], d1 * w1[:, 2:3]],
        axis=-1)                                               # (n_h1, 4T)

    # ---- layer 2: one fused MXU matmul for forward + Jacobian ----
    m2 = jnp.dot(w2, r1, preferred_element_type=f32)           # (n_h2, 4T)
    z2 = jnp.tanh(m2[:, :T] + b2)
    d2 = 1.0 - z2 * z2
    r2 = jnp.concatenate(
        [z2, d2 * m2[:, T:2 * T], d2 * m2[:, 2 * T:3 * T], d2 * m2[:, 3 * T:]],
        axis=-1)                                               # (n_h2, 4T)

    # ---- layer 3 ----
    m3 = jnp.dot(w3, r2, preferred_element_type=f32)           # (n_h3, 4T)
    z3 = jnp.tanh(m3[:, :T] + b3)
    d3 = 1.0 - z3 * z3
    r3 = jnp.concatenate(
        [z3, d3 * m3[:, T:2 * T], d3 * m3[:, 2 * T:3 * T], d3 * m3[:, 3 * T:]],
        axis=-1)                                               # (n_h3, 4T)

    # ---- layer 4 ----
    m4 = jnp.dot(w4, r3, preferred_element_type=f32)           # (n_o, 4T)
    y = m4[:, :T] + b4                                         # (n_o, T)

    # ---- single dense (4*n_o, T) store: [y ; dy/dx1 ; dy/dx2 ; dy/dx3] ----
    out_ref[...] = jnp.concatenate(
        [y, m4[:, T:2 * T], m4[:, 2 * T:3 * T], m4[:, 3 * T:]], axis=0)


def derivnet3d_pallas(x, w1, b1, w2, b2, w3, b3, w4, b4, *, tile_nx=2048):
    """x: (nx, 3); weights in torch layout w_i: (out_features, in_features)."""
    nx, n_in = x.shape
    assert n_in == 3, "DerivNet3D differentiates w.r.t. exactly 3 inputs"
    n_h1, n_h2, n_h3, n_o = w1.shape[0], w2.shape[0], w3.shape[0], w4.shape[0]
    f32 = jnp.float32

    # ---- tile selection: multiple of 256, >=256, >=2 grid steps if possible ----
    tile_req = max(256, (int(tile_nx) // 256) * 256)
    nx_r = ((nx + 255) // 256) * 256
    if nx_r >= 512:
        tile_cap = max(256, ((nx_r // 2) // 256) * 256)   # keep both v7x TCs busy
    else:
        tile_cap = nx_r
    tile = min(tile_req, tile_cap)
    nx_pad = ((nx + tile - 1) // tile) * tile             # multiple of tile (and 256)

    # Lane-dense layout: batch on the last axis; pad once with jnp.pad.
    xt = jnp.pad(x.T.astype(f32), ((0, 0), (0, nx_pad - nx)))

    args = (
        xt,
        w1.astype(f32), b1.reshape(-1, 1).astype(f32),
        w2.astype(f32), b2.reshape(-1, 1).astype(f32),
        w3.astype(f32), b3.reshape(-1, 1).astype(f32),
        w4.astype(f32), b4.reshape(-1, 1).astype(f32),
    )

    const = lambda i: (0, 0)           # weights / biases stay VMEM-resident
    in_specs = [
        pl.BlockSpec((n_in, tile), lambda i: (0, i)),
        pl.BlockSpec((n_h1, n_in), const), pl.BlockSpec((n_h1, 1), const),
        pl.BlockSpec((n_h2, n_h1), const), pl.BlockSpec((n_h2, 1), const),
        pl.BlockSpec((n_h3, n_h2), const), pl.BlockSpec((n_h3, 1), const),
        pl.BlockSpec((n_o, n_h3), const), pl.BlockSpec((n_o, 1), const),
    ]
    out_spec = pl.BlockSpec((4 * n_o, tile), lambda i: (0, i))

    packed = pl.pallas_call(
        _derivnet3d_kernel,
        out_shape=jax.ShapeDtypeStruct((4 * n_o, nx_pad), f32),
        grid=(nx_pad // tile,),
        in_specs=in_specs,
        out_specs=out_spec,
        compiler_params=pltpu.CompilerParams(
            dimension_semantics=("parallel",),      # megacore sharding on v7x
            vmem_limit_bytes=32 * 1024 * 1024),     # headroom on v5e defaults
    )(*args)

    # Single transpose back to (nx, 4*n_o); then cheap column slices.
    full = packed[:, :nx].T
    y = full[:, 0 * n_o:1 * n_o]
    dydx1 = full[:, 1 * n_o:2 * n_o]
    dydx2 = full[:, 2 * n_o:3 * n_o]
    dydx3 = full[:, 3 * n_o:4 * n_o]
    return y, dydx1, dydx2, dydx3


def derivnet3d_ref(x, w1, b1, w2, b2, w3, b3, w4, b4):
    """Plain-JAX reference mirroring the torch forward exactly."""
    h1 = x @ w1.T + b1
    z1 = jnp.tanh(h1)
    h2 = z1 @ w2.T + b2
    z2 = jnp.tanh(h2)
    h3 = z2 @ w3.T + b3
    z3 = jnp.tanh(h3)
    y = z3 @ w4.T + b4

    nx = x.shape[0]
    deriv = lambda h: 4.0 / jnp.square(jnp.exp(-h.T) + jnp.exp(h.T))
    dz1dh1 = deriv(h1)      # (n_h1, nx)
    dz2dh2 = deriv(h2)      # (n_h2, nx)
    dz3dh3 = deriv(h3)      # (n_h3, nx)

    outs = []
    for k in range(3):
        dh1dxk = jnp.repeat(w1[:, k][:, None], nx, axis=1)   # (n_h1, nx)
        inner = w2 @ (dz1dh1 * dh1dxk)
        inner = w3 @ (dz2dh2 * inner)
        outs.append((w4 @ (dz3dh3 * inner)).T)               # (nx, n_o)
    return (y, *outs)


if __name__ == "__main__":
    nx, n_in, n_h1, n_h2, n_h3, n_o = 8, 3, 32, 16, 32, 4

    key = jax.random.PRNGKey(0)
    ks = jax.random.split(key, 10)
    x = jax.random.normal(ks[0], (nx, n_in), dtype=jnp.float32)
    w1 = jax.random.normal(ks[1], (n_h1, n_in), dtype=jnp.float32) * 0.5
    b1 = jax.random.normal(ks[2], (n_h1,), dtype=jnp.float32) * 0.1
    w2 = jax.random.normal(ks[3], (n_h2, n_h1), dtype=jnp.float32) * 0.3
    b2 = jax.random.normal(ks[4], (n_h2,), dtype=jnp.float32) * 0.1
    w3 = jax.random.normal(ks[5], (n_h3, n_h2), dtype=jnp.float32) * 0.3
    b3 = jax.random.normal(ks[6], (n_h3,), dtype=jnp.float32) * 0.1
    w4 = jax.random.normal(ks[7], (n_o, n_h3), dtype=jnp.float32) * 0.3
    b4 = jax.random.normal(ks[8], (n_o,), dtype=jnp.float32) * 0.1
    params = (w1, b1, w2, b2, w3, b3, w4, b4)

    # small-batch check (single 256-lane grid step, padded)
    outs = jax.block_until_ready(derivnet3d_pallas(x, *params))
    refs = derivnet3d_ref(x, *params)
    for got, ref in zip(outs, refs):
        assert got.shape == ref.shape, (got.shape, ref.shape)
        assert jnp.allclose(got, ref, atol=1e-4, rtol=1e-4), \
            float(jnp.max(jnp.abs(got - ref)))

    # multi-tile grid check (nx=384 -> tile=256, 2 grid steps)
    x2 = jax.random.normal(ks[9], (384, n_in), dtype=jnp.float32)
    outs2 = jax.block_until_ready(derivnet3d_pallas(x2, *params))
    refs2 = derivnet3d_ref(x2, *params)
    for got, ref in zip(outs2, refs2):
        assert got.shape == ref.shape, (got.shape, ref.shape)
        assert jnp.allclose(got, ref, atol=1e-4, rtol=1e-4), \
            float(jnp.max(jnp.abs(got - ref)))

    print("KERNEL_OK")
</pallas_src>

<mosaic_0001>
module attributes {stable_mosaic.version = 11 : i64} {
  func.func @_derivnet3d_kernel(%arg0: i32, %arg1: memref<3x256xf32, #tpu.memory_space<vmem>>, %arg2: memref<32x3xf32, #tpu.memory_space<vmem>>, %arg3: memref<32x1xf32, #tpu.memory_space<vmem>>, %arg4: memref<16x32xf32, #tpu.memory_space<vmem>>, %arg5: memref<16x1xf32, #tpu.memory_space<vmem>>, %arg6: memref<32x16xf32, #tpu.memory_space<vmem>>, %arg7: memref<32x1xf32, #tpu.memory_space<vmem>>, %arg8: memref<4x32xf32, #tpu.memory_space<vmem>>, %arg9: memref<4x1xf32, #tpu.memory_space<vmem>>, %arg10: memref<16x256xf32, #tpu.memory_space<vmem>>) attributes {dimension_semantics = [#tpu.dimension_semantics<parallel>], iteration_bounds = array<i64: 1>, scalar_prefetch = 0 : i64, scratch_operands = 0 : i64, tpu.core_type = #tpu.core_type<tc>, window_params = [{transform_indices = @transform_0, window_bounds = array<i64: 3, 256>}, {pipeline_mode = #tpu.pipeline_mode<synchronous>, transform_indices = @transform_1, window_bounds = array<i64: 32, 3>}, {pipeline_mode = #tpu.pipeline_mode<synchronous>, transform_indices = @transform_2, window_bounds = array<i64: 32, 1>}, {pipeline_mode = #tpu.pipeline_mode<synchronous>, transform_indices = @transform_3, window_bounds = array<i64: 16, 32>}, {pipeline_mode = #tpu.pipeline_mode<synchronous>, transform_indices = @transform_4, window_bounds = array<i64: 16, 1>}, {pipeline_mode = #tpu.pipeline_mode<synchronous>, transform_indices = @transform_5, window_bounds = array<i64: 32, 16>}, {pipeline_mode = #tpu.pipeline_mode<synchronous>, transform_indices = @transform_6, window_bounds = array<i64: 32, 1>}, {pipeline_mode = #tpu.pipeline_mode<synchronous>, transform_indices = @transform_7, window_bounds = array<i64: 4, 32>}, {pipeline_mode = #tpu.pipeline_mode<synchronous>, transform_indices = @transform_8, window_bounds = array<i64: 4, 1>}, {transform_indices = @transform_9, window_bounds = array<i64: 16, 256>}]} {
    %c0 = arith.constant 0 : index
    %c0_0 = arith.constant 0 : index
    %0 = vector.load %arg1[%c0, %c0_0] : memref<3x256xf32, #tpu.memory_space<vmem>>, vector<3x256xf32>
    %c0_1 = arith.constant 0 : index
    %c0_2 = arith.constant 0 : index
    %1 = vector.load %arg2[%c0_1, %c0_2] : memref<32x3xf32, #tpu.memory_space<vmem>>, vector<32x3xf32>
    %c0_3 = arith.constant 0 : index
    %c0_4 = arith.constant 0 : index
    %2 = vector.load %arg4[%c0_3, %c0_4] : memref<16x32xf32, #tpu.memory_space<vmem>>, vector<16x32xf32>
    %c0_5 = arith.constant 0 : index
    %c0_6 = arith.constant 0 : index
    %3 = vector.load %arg6[%c0_5, %c0_6] : memref<32x16xf32, #tpu.memory_space<vmem>>, vector<32x16xf32>
    %c0_7 = arith.constant 0 : index
    %c0_8 = arith.constant 0 : index
    %4 = vector.load %arg8[%c0_7, %c0_8] : memref<4x32xf32, #tpu.memory_space<vmem>>, vector<4x32xf32>
    %c0_9 = arith.constant 0 : index
    %c0_10 = arith.constant 0 : index
    %5 = vector.load %arg3[%c0_9, %c0_10] : memref<32x1xf32, #tpu.memory_space<vmem>>, vector<32x1xf32>
    %c0_11 = arith.constant 0 : index
    %c0_12 = arith.constant 0 : index
    %6 = vector.load %arg5[%c0_11, %c0_12] : memref<16x1xf32, #tpu.memory_space<vmem>>, vector<16x1xf32>
    %c0_13 = arith.constant 0 : index
    %c0_14 = arith.constant 0 : index
    %7 = vector.load %arg7[%c0_13, %c0_14] : memref<32x1xf32, #tpu.memory_space<vmem>>, vector<32x1xf32>
    %c0_15 = arith.constant 0 : index
    %c0_16 = arith.constant 0 : index
    %8 = vector.load %arg9[%c0_15, %c0_16] : memref<4x1xf32, #tpu.memory_space<vmem>>, vector<4x1xf32>
    %9 = vector.extract_strided_slice %1 {offsets = [0, 0], sizes = [32, 1], strides = [1, 1]} : vector<32x3xf32> to vector<32x1xf32>
    %10 = vector.extract_strided_slice %0 {offsets = [0, 0], sizes = [1, 256], strides = [1, 1]} : vector<3x256xf32> to vector<1x256xf32>
    %11 = vector.broadcast %9 : vector<32x1xf32> to vector<32x256xf32>
    %12 = vector.broadcast %10 : vector<1x256xf32> to vector<32x256xf32>
    %13 = arith.mulf %11, %12 : vector<32x256xf32>
    %14 = vector.extract_strided_slice %1 {offsets = [0, 1], sizes = [32, 1], strides = [1, 1]} : vector<32x3xf32> to vector<32x1xf32>
    %15 = vector.extract_strided_slice %0 {offsets = [1, 0], sizes = [1, 256], strides = [1, 1]} : vector<3x256xf32> to vector<1x256xf32>
    %16 = vector.broadcast %14 : vector<32x1xf32> to vector<32x256xf32>
    %17 = vector.broadcast %15 : vector<1x256xf32> to vector<32x256xf32>
    %18 = arith.mulf %16, %17 : vector<32x256xf32>
    %19 = arith.addf %13, %18 : vector<32x256xf32>
    %20 = vector.extract_strided_slice %1 {offsets = [0, 2], sizes = [32, 1], strides = [1, 1]} : vector<32x3xf32> to vector<32x1xf32>
    %21 = vector.extract_strided_slice %0 {offsets = [2, 0], sizes = [1, 256], strides = [1, 1]} : vector<3x256xf32> to vector<1x256xf32>
    %22 = vector.broadcast %20 : vector<32x1xf32> to vector<32x256xf32>
    %23 = vector.broadcast %21 : vector<1x256xf32> to vector<32x256xf32>
    %24 = arith.mulf %22, %23 : vector<32x256xf32>
    %25 = arith.addf %19, %24 : vector<32x256xf32>
    %26 = vector.broadcast %5 : vector<32x1xf32> to vector<32x256xf32>
    %27 = arith.addf %25, %26 : vector<32x256xf32>
    %28 = math.tanh %27 : vector<32x256xf32>
    %29 = arith.mulf %28, %28 : vector<32x256xf32>
    %cst = arith.constant 1.000000e+00 : f32
    %30 = vector.broadcast %cst : f32 to vector<32x256xf32>
    %31 = arith.subf %30, %29 : vector<32x256xf32>
    %32 = vector.extract_strided_slice %1 {offsets = [0, 0], sizes = [32, 1], strides = [1, 1]} : vector<32x3xf32> to vector<32x1xf32>
    %33 = vector.broadcast %32 : vector<32x1xf32> to vector<32x256xf32>
    %34 = arith.mulf %31, %33 : vector<32x256xf32>
    %35 = vector.extract_strided_slice %1 {offsets = [0, 1], sizes = [32, 1], strides = [1, 1]} : vector<32x3xf32> to vector<32x1xf32>
    %36 = vector.broadcast %35 : vector<32x1xf32> to vector<32x256xf32>
    %37 = arith.mulf %31, %36 : vector<32x256xf32>
    %38 = vector.extract_strided_slice %1 {offsets = [0, 2], sizes = [32, 1], strides = [1, 1]} : vector<32x3xf32> to vector<32x1xf32>
    %39 = vector.broadcast %38 : vector<32x1xf32> to vector<32x256xf32>
    %40 = arith.mulf %31, %39 : vector<32x256xf32>
    %41 = tpu.concatenate %28, %34, %37, %40 in 1 : vector<32x256xf32>, vector<32x256xf32>, vector<32x256xf32>, vector<32x256xf32> -> vector<32x1024xf32>
    %cst_17 = arith.constant dense<0.000000e+00> : vector<16x1024xf32>
    %42 = tpu.matmul %2, %41, %cst_17 {dimension_numbers = #tpu.dot_dimension_numbers<[1], [0], [0], [1], [0, 0, 1, 1], [], []>} : vector<16x32xf32>, vector<32x1024xf32>, vector<16x1024xf32> -> vector<16x1024xf32>
    %43 = vector.extract_strided_slice %42 {offsets = [0, 0], sizes = [16, 256], strides = [1, 1]} : vector<16x1024xf32> to vector<16x256xf32>
    %44 = vector.broadcast %6 : vector<16x1xf32> to vector<16x256xf32>
    %45 = arith.addf %43, %44 : vector<16x256xf32>
    %46 = math.tanh %45 : vector<16x256xf32>
    %47 = arith.mulf %46, %46 : vector<16x256xf32>
    %cst_18 = arith.constant 1.000000e+00 : f32
    %48 = vector.broadcast %cst_18 : f32 to vector<16x256xf32>
    %49 = arith.subf %48, %47 : vector<16x256xf32>
    %50 = vector.extract_strided_slice %42 {offsets = [0, 256], sizes = [16, 256], strides = [1, 1]} : vector<16x1024xf32> to vector<16x256xf32>
    %51 = arith.mulf %49, %50 : vector<16x256xf32>
    %52 = vector.extract_strided_slice %42 {offsets = [0, 512], sizes = [16, 256], strides = [1, 1]} : vector<16x1024xf32> to vector<16x256xf32>
    %53 = arith.mulf %49, %52 : vector<16x256xf32>
    %54 = vector.extract_strided_slice %42 {offsets = [0, 768], sizes = [16, 256], strides = [1, 1]} : vector<16x1024xf32> to vector<16x256xf32>
    %55 = arith.mulf %49, %54 : vector<16x256xf32>
    %56 = tpu.concatenate %46, %51, %53, %55 in 1 : vector<16x256xf32>, vector<16x256xf32>, vector<16x256xf32>, vector<16x256xf32> -> vector<16x1024xf32>
    %cst_19 = arith.constant dense<0.000000e+00> : vector<32x1024xf32>
    %57 = tpu.matmul %3, %56, %cst_19 {dimension_numbers = #tpu.dot_dimension_numbers<[1], [0], [0], [1], [0, 0, 1, 1], [], []>} : vector<32x16xf32>, vector<16x1024xf32>, vector<32x1024xf32> -> vector<32x1024xf32>
    %58 = vector.extract_strided_slice %57 {offsets = [0, 0], sizes = [32, 256], strides = [1, 1]} : vector<32x1024xf32> to vector<32x256xf32>
    %59 = vector.broadcast %7 : vector<32x1xf32> to vector<32x256xf32>
    %60 = arith.addf %58, %59 : vector<32x256xf32>
    %61 = math.tanh %60 : vector<32x256xf32>
    %62 = arith.mulf %61, %61 : vector<32x256xf32>
    %cst_20 = arith.constant 1.000000e+00 : f32
    %63 = vector.broadcast %cst_20 : f32 to vector<32x256xf32>
    %64 = arith.subf %63, %62 : vector<32x256xf32>
    %65 = vector.extract_strided_slice %57 {offsets = [0, 256], sizes = [32, 256], strides = [1, 1]} : vector<32x1024xf32> to vector<32x256xf32>
    %66 = arith.mulf %64, %65 : vector<32x256xf32>
    %67 = vector.extract_strided_slice %57 {offsets = [0, 512], sizes = [32, 256], strides = [1, 1]} : vector<32x1024xf32> to vector<32x256xf32>
    %68 = arith.mulf %64, %67 : vector<32x256xf32>
    %69 = vector.extract_strided_slice %57 {offsets = [0, 768], sizes = [32, 256], strides = [1, 1]} : vector<32x1024xf32> to vector<32x256xf32>
    %70 = arith.mulf %64, %69 : vector<32x256xf32>
    %71 = tpu.concatenate %61, %66, %68, %70 in 1 : vector<32x256xf32>, vector<32x256xf32>, vector<32x256xf32>, vector<32x256xf32> -> vector<32x1024xf32>
    %cst_21 = arith.constant dense<0.000000e+00> : vector<4x1024xf32>
    %72 = tpu.matmul %4, %71, %cst_21 {dimension_numbers = #tpu.dot_dimension_numbers<[1], [0], [0], [1], [0, 0, 1, 1], [], []>} : vector<4x32xf32>, vector<32x1024xf32>, vector<4x1024xf32> -> vector<4x1024xf32>
    %73 = vector.extract_strided_slice %72 {offsets = [0, 0], sizes = [4, 256], strides = [1, 1]} : vector<4x1024xf32> to vector<4x256xf32>
    %74 = vector.broadcast %8 : vector<4x1xf32> to vector<4x256xf32>
    %75 = arith.addf %73, %74 : vector<4x256xf32>
    %76 = vector.extract_strided_slice %72 {offsets = [0, 256], sizes = [4, 256], strides = [1, 1]} : vector<4x1024xf32> to vector<4x256xf32>
    %77 = vector.extract_strided_slice %72 {offsets = [0, 512], sizes = [4, 256], strides = [1, 1]} : vector<4x1024xf32> to vector<4x256xf32>
    %78 = vector.extract_strided_slice %72 {offsets = [0, 768], sizes = [4, 256], strides = [1, 1]} : vector<4x1024xf32> to vector<4x256xf32>
    %79 = tpu.concatenate %75, %76, %77, %78 in 0 : vector<4x256xf32>, vector<4x256xf32>, vector<4x256xf32>, vector<4x256xf32> -> vector<16x256xf32>
    %c0_22 = arith.constant 0 : index
    %c0_23 = arith.constant 0 : index
    %80 = vector.load %arg10[%c0_22, %c0_23] : memref<16x256xf32, #tpu.memory_space<vmem>>, vector<16x256xf32>
    tpu.vector_store %arg10[%c0_22, %c0_23], %79 {strides = array<i32>} : memref<16x256xf32, #tpu.memory_space<vmem>>, vector<16x256xf32>,
    return
  }
  func.func @transform_0(%arg0: i32) -> (i32, i32) {
    %c0_i32 = arith.constant 0 : i32
    %c0_i32_0 = arith.constant 0 : i32
    return %c0_i32, %arg0 : i32, i32
  }
  func.func @transform_1(%arg0: i32) -> (i32, i32) {
    %c0_i32 = arith.constant 0 : i32
    %c0_i32_0 = arith.constant 0 : i32
    %c0_i32_1 = arith.constant 0 : i32
    return %c0_i32, %c0_i32_0 : i32, i32
  }
  func.func @transform_2(%arg0: i32) -> (i32, i32) {
    %c0_i32 = arith.constant 0 : i32
    %c0_i32_0 = arith.constant 0 : i32
    %c0_i32_1 = arith.constant 0 : i32
    return %c0_i32, %c0_i32_0 : i32, i32
  }
  func.func @transform_3(%arg0: i32) -> (i32, i32) {
    %c0_i32 = arith.constant 0 : i32
    %c0_i32_0 = arith.constant 0 : i32
    %c0_i32_1 = arith.constant 0 : i32
    return %c0_i32, %c0_i32_0 : i32, i32
  }
  func.func @transform_4(%arg0: i32) -> (i32, i32) {
    %c0_i32 = arith.constant 0 : i32
    %c0_i32_0 = arith.constant 0 : i32
    %c0_i32_1 = arith.constant 0 : i32
    return %c0_i32, %c0_i32_0 : i32, i32
  }
  func.func @transform_5(%arg0: i32) -> (i32, i32) {
    %c0_i32 = arith.constant 0 : i32
    %c0_i32_0 = arith.constant 0 : i32
    %c0_i32_1 = arith.constant 0 : i32
    return %c0_i32, %c0_i32_0 : i32, i32
  }
  func.func @transform_6(%arg0: i32) -> (i32, i32) {
    %c0_i32 = arith.constant 0 : i32
    %c0_i32_0 = arith.constant 0 : i32
    %c0_i32_1 = arith.constant 0 : i32
    return %c0_i32, %c0_i32_0 : i32, i32
  }
  func.func @transform_7(%arg0: i32) -> (i32, i32) {
    %c0_i32 = arith.constant 0 : i32
    %c0_i32_0 = arith.constant 0 : i32
    %c0_i32_1 = arith.constant 0 : i32
    return %c0_i32, %c0_i32_0 : i32, i32
  }
  func.func @transform_8(%arg0: i32) -> (i32, i32) {
    %c0_i32 = arith.constant 0 : i32
    %c0_i32_0 = arith.constant 0 : i32
    %c0_i32_1 = arith.constant 0 : i32
    return %c0_i32, %c0_i32_0 : i32, i32
  }
  func.func @transform_9(%arg0: i32) -> (i32, i32) {
    %c0_i32 = arith.constant 0 : i32
    %c0_i32_0 = arith.constant 0 : i32
    return %c0_i32, %arg0 : i32, i32
  }
}

</mosaic_0001>

<bundles_post_ra>
// kernel: tpu_custom_call.1
= control target key start
LH: loop header
LB: loop body
LE: loop exit
PB: predicated region body
PF: predicated region fallthrough
CT: control target
= control target key end

     0   :  { %v1517_v2 = vmov 1   ;;  %v1518_v3 = vmov 0   ;;  %v1519_v5 = vmov 2   ;;  %s1817_s0 = inlined_call_operand.vmem [shape: f32[3,256], index: 0, kind: input, shape index: {}]   ;;  %s1818_s1 = inlined_call_operand.vmem [shape: f32[32,3], index: 1, kind: input, shape index: {}]   ;;  %s1819_s2 = inlined_call_operand.vmem [shape: f32[32,1], index: 2, kind: input, shape index: {}]   ;;  %s1820_s3 = inlined_call_operand.vmem [shape: f32[16,32], index: 3, kind: input, shape index: {}]   ;;  %s1821_s4 = inlined_call_operand.vmem [shape: f32[16,1], index: 4, kind: input, shape index: {}]   ;;  %s1822_s5 = inlined_call_operand.vmem [shape: f32[32,16], index: 5, kind: input, shape index: {}]   ;;  %s1823_s6 = inlined_call_operand.vmem [shape: f32[32,1], index: 6, kind: input, shape index: {}]   ;;  %s1824_s7 = inlined_call_operand.vmem [shape: f32[4,32], index: 7, kind: input, shape index: {}]   ;;  %s1825_s8 = inlined_call_operand.vmem [shape: f32[4,1], index: 8, kind: input, shape index: {}]   ;;  %s1826_s9 = inlined_call_operand.hbm [shape: f32[16,256], index: 9, kind: output, shape index: {}]  }
   0x1   :  { %v37_v0 = vld [vmem:[%s1818_s1 + $0x18] sm:$0xff]  ;;  %v36_v1 = vld [vmem:[%s1818_s1 + $0x10] sm:$0xff]  ;;  %1443 = vset.pattern.permute.xlu0 %v1517_v2  ;;  %1444 = vset.pattern.permute.xlu1 %v1518_v3  ;;  %v35_v4 = vld [vmem:[%s1818_s1 + $0x8] sm:$0xff] }
   0x2   :  { %116 = vperm.xlu0 %1443, %v37_v0   ;;  %68 = vperm.xlu1 %1444, %v36_v1  }
   0x6   :  { %1450 = vset.pattern.permute.xlu0 %v1519_v5  ;;  %1445 = vset.pattern.permute.xlu1 %v1517_v2 }
   0x7   :  { %14 = vsyncpa [#allocation3], 0  ;;  %112 = vperm.xlu1 %1445, %v36_v1   ;;  %158 = vperm.xlu0 %1450, %v35_v4   ;;  %v34_v6 = vld [vmem:[%s1818_s1] sm:$0xff]  ;;  %v47_v7 = vld [vmem:[%s1819_s2 + $0x10] sm:$0xff]  ;;  %v1520_v18 = vmov 0.0   ;;  %v77_v19 = vlaneseq  ;;  %vm279_vm0 = vcmask 261120  }
   0x8   :  { %v50_v8 = vld [vmem:[%s1821_s4 + $0x8] sm:$0xff]  ;;  %v54_v9 = vld [vmem:[%s1823_s6 + $0x18] sm:$0xff]  ;;  %v55_v12 = vld [vmem:[%s1825_s8] sm:$0xf]  ;;  %350 = vmatprep.mubr.f32.mxu0 %v1520_v18  ;;  %427 = vmatprep.mubr.f32.mxu1 %v1520_v18  ;;  %vm632_vm1 = vcmask 130048   ;;  %vm1383_vm2 = vcmask 1043456  }
   0x9   :  { %v48_v10 = vld [vmem:[%s1819_s2 + $0x18] sm:$0xff]  ;;  %v52_v11 = vld [vmem:[%s1823_s6 + $0x8] sm:$0xff]  ;;  %v45_v14 = vld [vmem:[%s1819_s2] sm:$0xff]  ;;  %v78_v22 = vshrl.u32 %v77_v19, 7 }
   0xa   :  { %v46_v13 = vld [vmem:[%s1819_s2 + $0x8] sm:$0xff]  ;;  %v49_v15 = vld [vmem:[%s1821_s4] sm:$0xff]  ;;  %v53_v16 = vld [vmem:[%s1823_s6 + $0x10] sm:$0xff] }
   0xb   :  { %1446 = vset.pattern.permute.xlu1 %v1519_v5  ;;  %1451 = vset.pattern.permute.xlu0 %v1518_v3  ;;  %v51_v17 = vld [vmem:[%s1823_s6] sm:$0xff]  ;;  %v121_v23 = vsub.s32 1, %v78_v22  ;;  %v125_v24 = vsub.s32 5, %v78_v22  ;;  %v79_v27 = vsub.s32 0, %v78_v22  ;;  %v83_v28 = vsub.s32 4, %v78_v22 }
   0xc   :  { %166 = vperm.xlu1 %1446, %v37_v0   ;;  %73 = vperm.xlu0 %1451, %v37_v0   ;;  %v33_v29 = vld [vmem:[%s1817_s0] sm:$0x77]  ;;  %v171_v36 = vsub.s32 2, %v78_v22  ;;  %v175_v37 = vsub.s32 6, %v78_v22 }
   0xd   :  { %v122_v30 = vrot.slane %v33_v29, %v121_v23  ;;  %v126_v31 = vrot.slane %v33_v29, %v125_v24  ;;  %v80_v32 = vrot.slane %v33_v29, %v79_v27  ;;  %v84_v33 = vrot.slane %v33_v29, %v83_v28 }
   0xe   :  { %v172_v44 = vrot.slane %v33_v29, %v171_v36  ;;  %v176_v45 = vrot.slane %v33_v29, %v175_v37 }
   0xf   :  { %v132_v38 = vrot.slane %v122_v30, %v121_v23  ;;  %v136_v39 = vrot.slane %v126_v31, %v121_v23  ;;  %v90_v40 = vrot.slane %v80_v32, %v79_v27  ;;  %v94_v41 = vrot.slane %v84_v33, %v79_v27 }
  0x10   :  { %1447 = vset.pattern.permute.xlu1 %v1517_v2  ;;  %63 = vperm.xlu0 %1451, %v35_v4   ;;  %v182_v51 = vrot.slane %v172_v44, %v171_v36  ;;  %v186_v52 = vrot.slane %v176_v45, %v171_v36 }
  0x11   :  { %108 = vperm.xlu1 %1447, %v35_v4  }
  0x14   :  { %58 = vperm.xlu0 %1451, %v34_v6  }
  0x15   :  { %1448 = vset.pattern.permute.xlu1 %v1519_v5 }
  0x16   :  { %162 = vperm.xlu1 %1448, %v36_v1  }
  0x18   :  { %215 = vperm.xlu0 %1451, %v47_v7  }
  0x1a   :  { %1449 = vset.pattern.permute.xlu1 %v1517_v2 }
  0x1b   :  { %104 = vperm.xlu1 %1449, %v34_v6  }
  0x1c   :  { %601 = vperm.xlu0 %1451, %v50_v8  }
  0x1f   :  { %1452 = vset.pattern.permute.xlu1 %v1518_v3 }
  0x20   :  { %1018 = vperm.xlu0 %1451, %v54_v9   ;;  %220 = vperm.xlu1 %1452, %v48_v10  }
  0x24   :  { %1008 = vperm.xlu0 %1451, %v52_v11   ;;  %1453 = vset.pattern.permute.xlu1 %v1519_v5 }
  0x25   :  { %154 = vperm.xlu1 %1453, %v34_v6  }
  0x28   :  { %1366 = vperm.xlu0 %1451, %v55_v12  }
  0x29   :  { %1454 = vset.pattern.permute.xlu1 %v1518_v3 }
  0x2a   :  { %210 = vperm.xlu1 %1454, %v46_v13  }
  0x2e   :  { %205 = vperm.xlu1 %1454, %v45_v14  }
  0x32   :  { %596 = vperm.xlu1 %1454, %v49_v15  }
  0x36   :  { %1013 = vperm.xlu1 %1454, %v53_v16  }
  0x3a   :  { %1003 = vperm.xlu1 %1454, %v51_v17  }
  0x7d   :  { %v1621_v20 = vpop.permute.xlu1 %68  ;;  %v1623_v21 = vpop.permute.xlu0 %116 }
  0x7e   :  { %v99_v48 = vmul.f32 %v90_v40, %v1621_v20  ;;  %v100_v49 = vmul.f32 %v94_v41, %v1621_v20  ;;  %v143_v53 = vmul.f32 %v132_v38, %v1623_v21  ;;  %v144_v54 = vmul.f32 %v136_v39, %v1623_v21 }
  0x82   :  { %v1625_v25 = vpop.permute.xlu1 %112  ;;  %v1627_v26 = vpop.permute.xlu0 %158 }
  0x83   :  { %v141_v46 = vmul.f32 %v132_v38, %v1625_v25  ;;  %v142_v47 = vmul.f32 %v136_v39, %v1625_v25  ;;  %v189_v23 = vmul.f32 %v182_v51, %v1627_v26  ;;  %v190_v24 = vmul.f32 %v186_v52, %v1627_v26 }
  0x85   :  { %v149_v56 = vadd.f32 %v141_v46, %v99_v48  ;;  %v150_v57 = vadd.f32 %v142_v47, %v100_v49 }
  0x87   :  { %v1632_v34 = vpop.permute.xlu1 %166  ;;  %v1634_v35 = vpop.permute.xlu0 %73 }
  0x88   :  { %v101_v58 = vmul.f32 %v90_v40, %v1634_v35  ;;  %v102_v59 = vmul.f32 %v94_v41, %v1634_v35  ;;  %v193_v6 = vmul.f32 %v182_v51, %v1632_v34  ;;  %v194_v7 = vmul.f32 %v186_v52, %v1632_v34 }
  0x8a   :  { %v151_v2 = vadd.f32 %v143_v53, %v101_v58  ;;  %v152_v3 = vadd.f32 %v144_v54, %v102_v59 }
  0x8b   :  { %v1636_v42 = vpop.permute.xlu0 %63 }
  0x8c   :  { %v1638_v43 = vpop.permute.xlu1 %108  ;;  %v201_v8 = vadd.f32 %v193_v6, %v151_v2  ;;  %v202_v9 = vadd.f32 %v194_v7, %v152_v3  ;;  %v97_v10 = vmul.f32 %v90_v40, %v1636_v42  ;;  %v98_v11 = vmul.f32 %v94_v41, %v1636_v42 }
  0x8d   :  { %v139_v12 = vmul.f32 %v132_v38, %v1638_v43  ;;  %v140_v14 = vmul.f32 %v136_v39, %v1638_v43 }
  0x8f   :  { %v1644_v50 = vpop.permute.xlu0 %58  ;;  %v147_v19 = vadd.f32 %v139_v12, %v97_v10  ;;  %v148_v22 = vadd.f32 %v140_v14, %v98_v11 }
  0x90   :  { %v95_v27 = vmul.f32 %v90_v40, %v1644_v50  ;;  %v96_v28 = vmul.f32 %v94_v41, %v1644_v50 }
  0x91   :  { %v1648_v55 = vpop.permute.xlu1 %162  ;;  %v197_v31 = vadd.f32 %v189_v23, %v147_v19  ;;  %v198_v32 = vadd.f32 %v190_v24, %v148_v22  ;;  %v39_v24 = vld [vmem:[%s1820_s3 + $0x8] sm:$0xff] }
  0x92   :  { %v191_v60 = vmul.f32 %v182_v51, %v1648_v55  ;;  %v192_v61 = vmul.f32 %v186_v52, %v1648_v55 }
  0x93   :  { %v216_v0 = vpop.permute.xlu0 %215 }
  0x94   :  { %v199_v62 = vadd.f32 %v191_v60, %v149_v56  ;;  %v200_v63 = vadd.f32 %v192_v61, %v150_v57 }
  0x96   :  { %v1654_v1 = vpop.permute.xlu1 %104  ;;  %v228_v4 = vadd.f32 %v216_v0, %v200_v63  ;;  %v227_v5 = vadd.f32 %v216_v0, %v199_v62 }
  0x97   :  { %v137_v29 = vmul.f32 %v132_v38, %v1654_v1  ;;  %v138_v30 = vmul.f32 %v136_v39, %v1654_v1 }
  0x98   :  { %1455 = vtanh.f32 %v228_v4 }
  0x99   :  { %1457 = vtanh.f32 %v227_v5  ;;  %v145_v46 = vadd.f32 %v137_v29, %v95_v27  ;;  %v146_v47 = vadd.f32 %v138_v30, %v96_v28 }
  0x9b   :  { %v221_v13 = vpop.permute.xlu1 %220 }
  0x9c   :  { %v229_v15 = vadd.f32 %v221_v13, %v201_v8  ;;  %v230_v16 = vadd.f32 %v221_v13, %v202_v9 }
  0x9e   :  { %1459 = vtanh.f32 %v229_v15 }
  0x9f   :  { %1461 = vtanh.f32 %v230_v16 }
  0xa0   :  { %v1662_v17 = vpop.permute.xlu1 %154 }
  0xa1   :  { %v187_v33 = vmul.f32 %v182_v51, %v1662_v17  ;;  %v188_v36 = vmul.f32 %v186_v52, %v1662_v17 }
  0xa3   :  { %v195_v40 = vadd.f32 %v187_v33, %v145_v46  ;;  %v196_v49 = vadd.f32 %v188_v36, %v146_v47 }
  0xa5   :  { %v211_v37 = vpop.permute.xlu1 %210  ;;  %v1456_v48 = vpop.eup %1455 }
  0xa6   :  { %v225_v44 = vadd.f32 %v211_v37, %v197_v31  ;;  %v226_v45 = vadd.f32 %v211_v37, %v198_v32  ;;  %v1458_v41 = vpop.eup %1457  ;;  %v244_v56 = vmul.f32 %v1456_v48, %v1456_v48 }
  0xa7   :  { %v243_v52 = vmul.f32 %v1458_v41, %v1458_v41 }
  0xa8   :  { %1463 = vtanh.f32 %v225_v44  ;;  %v252_v61 = vsub.f32 1.0, %v244_v56 }
  0xa9   :  { %1465 = vtanh.f32 %v226_v45  ;;  %v206_v38 = vpop.permute.xlu1 %205  ;;  %v251_v63 = vsub.f32 1.0, %v243_v52  ;;  %v602_v45 = vpop.permute.xlu0 %601 }
  0xaa   :  { %v223_v53 = vadd.f32 %v206_v38, %v195_v40  ;;  %v224_v39 = vadd.f32 %v206_v38, %v196_v49  ;;  %v260_v2 = vmul.f32 %v252_v61, %v1621_v20  ;;  %v268_v23 = vmul.f32 %v252_v61, %v1625_v25 }
  0xab   :  { %v1460_v54 = vpop.eup %1459  ;;  %v259_v3 = vmul.f32 %v251_v63, %v1621_v20  ;;  %v275_v32 = vmul.f32 %v251_v63, %v1648_v55 }
  0xac   :  { %v1462_v57 = vpop.eup %1461  ;;  %1467 = vtanh.f32 %v223_v53  ;;  %v245_v51 = vmul.f32 %v1460_v54, %v1460_v54 }
  0xad   :  { %1469 = vtanh.f32 %v224_v39  ;;  %310 = vmatprep.subr.mxu0 %v1462_v57  ;;  %v246_v58 = vmul.f32 %v1462_v57, %v1462_v57 }
  0xae   :  { %311 = vmatpush1.msra.mxu0 %v1460_v54  ;;  %v253_v59 = vsub.f32 1.0, %v245_v51 }
  0xaf   :  { %312 = vmatprep.subr.mxu0 %v1456_v48  ;;  %v254_v60 = vsub.f32 1.0, %v246_v58 }
  0xb0   :  { %313 = vmatpush1.msra.mxu0 %v1458_v41  ;;  %v261_v62 = vmul.f32 %v253_v59, %v1634_v35  ;;  %v269_v19 = vmul.f32 %v253_v59, %v1623_v21 }
  0xb1   :  { %v262_v0 = vmul.f32 %v254_v60, %v1634_v35  ;;  %v38_v35 = vld [vmem:[%s1820_s3] sm:$0xff]  ;;  %v270_v15 = vmul.f32 %v254_v60, %v1623_v21  ;;  %v278_v30 = vmul.f32 %v254_v60, %v1632_v34 }
  0xb3   :  { %387 = vmatprep.subr.mxu1 %v262_v0 }
  0xb4   :  { %388 = vmatpush1.msra.mxu1 %v261_v62 }
  0xb5   :  { %v1464_v4 = vpop.eup %1463  ;;  %389 = vmatprep.subr.mxu1 %v260_v2 }
  0xb6   :  { %v1466_v5 = vpop.eup %1465  ;;  %390 = vmatpush1.msra.mxu1 %v259_v3  ;;  %v241_v6 = vmul.f32 %v1464_v4, %v1464_v4 }
  0xb7   :  { %314 = vmatprep.subr.mxu0 %v1466_v5  ;;  %v242_v7 = vmul.f32 %v1466_v5, %v1466_v5 }
  0xb8   :  { %315 = vmatpush1.msra.mxu0 %v1464_v4  ;;  %v249_v8 = vsub.f32 1.0, %v241_v6  ;;  %v40_v4 = vld [vmem:[%s1822_s5] sm:$0xff] }
  0xb9   :  { %v1468_v9 = vpop.eup %1467  ;;  %v250_v10 = vsub.f32 1.0, %v242_v7 }
  0xba   :  { %v1470_v11 = vpop.eup %1469  ;;  %v257_v12 = vmul.f32 %v249_v8, %v1636_v42  ;;  %v239_v20 = vmul.f32 %v1468_v9, %v1468_v9  ;;  %v265_v29 = vmul.f32 %v249_v8, %v1638_v43 }
  0xbb   :  { %316 = vmatprep.subr.mxu0 %v1470_v11  ;;  %v258_v13 = vmul.f32 %v250_v10, %v1636_v42  ;;  %v240_v14 = vmul.f32 %v1470_v11, %v1470_v11  ;;  %v267_v42 = vmul.f32 %v251_v63, %v1625_v25  ;;  %v266_v21 = vmul.f32 %v250_v10, %v1638_v43 }
  0xbc   :  { %317 = vmatpush1.msra.mxu0 %v1468_v9  ;;  %v247_v16 = vsub.f32 1.0, %v239_v20  ;;  %v276_v43 = vmul.f32 %v252_v61, %v1648_v55  ;;  %v274_v33 = vmul.f32 %v250_v10, %v1627_v26 }
  0xbd   :  { %1408 = vmatmul.mubr.msk.f32.vlgmr.msra.gmra.mxu0 %vm279_vm0, %v38_v35  ;;  %391 = vmatprep.subr.mxu1 %v258_v13  ;;  %v248_v22 = vsub.f32 1.0, %v240_v14 }
  0xbe   :  { %464 = vmatprep.subr.mxu0 %v270_v15  ;;  %392 = vmatpush1.msra.mxu1 %v257_v12  ;;  %v255_v28 = vmul.f32 %v247_v16, %v1644_v50  ;;  %v263_v31 = vmul.f32 %v247_v16, %v1654_v1  ;;  %v271_v55 = vmul.f32 %v247_v16, %v1662_v17  ;;  %v41_v12 = vld [vmem:[%s1822_s5 + $0x8] sm:$0xff] }
  0xbf   :  { %465 = vmatpush1.msra.mxu0 %v269_v19  ;;  %356 = vmatprep.mubr.f32.mxu0 %v1520_v18  ;;  %v256_v27 = vmul.f32 %v248_v22, %v1644_v50  ;;  %v264_v25 = vmul.f32 %v248_v22, %v1654_v1  ;;  %v277_v50 = vmul.f32 %v253_v59, %v1632_v34 }
  0xc0   :  { %466 = vmatprep.subr.mxu0 %v268_v23  ;;  %v273_v1 = vmul.f32 %v249_v8, %v1627_v26  ;;  %v272_v34 = vmul.f32 %v248_v22, %v1662_v17  ;;  %v597_v17 = vpop.permute.xlu1 %596  ;;  %v42_v22 = vld [vmem:[%s1822_s5 + $0x10] sm:$0xff] }
  0xc1   :  { %467 = vmatpush1.msra.mxu0 %v267_v42  ;;  %393 = vmatprep.subr.mxu1 %v256_v27  ;;  %v43_v27 = vld [vmem:[%s1822_s5 + $0x18] sm:$0xff] }
  0xc2   :  { %1409 = vmatmul.mubr.msk.f32.gmra.mxu0 %vm279_vm0, %v39_v24  ;;  %468 = vmatprep.subr.mxu0 %v266_v21 }
  0xc3   :  { %394 = vmatpush1.msra.mxu1 %v255_v28  ;;  %469 = vmatpush1.msra.mxu0 %v265_v29  ;;  %v1019_v29 = vpop.permute.xlu0 %1018 }
  0xc4   :  { %470 = vmatprep.subr.mxu0 %v264_v25  ;;  %541 = vmatprep.subr.mxu1 %v278_v30  ;;  %v1014_v28 = vpop.permute.xlu1 %1013 }
  0xc5   :  { %1410 = vmatmul.mubr.msk.f32.vlgmr.msra.gmra.mxu1 %vm279_vm0, %v38_v35  ;;  %471 = vmatpush1.msra.mxu0 %v263_v31 }
  0xc6   :  { %542 = vmatpush1.msra.mxu1 %v277_v50  ;;  %433 = vmatprep.mubr.f32.mxu1 %v1520_v18 }
  0xc7   :  { %543 = vmatprep.subr.mxu1 %v276_v43  ;;  %504 = vmatprep.mubr.f32.mxu0 %v1520_v18 }
  0xc8   :  { %544 = vmatpush1.msra.mxu1 %v275_v32  ;;  %1412 = vmatmul.mubr.msk.f32.vlgmr.msra.gmra.mxu0 %vm279_vm0, %v38_v35  ;;  %v1004_v31 = vpop.permute.xlu1 %1003  ;;  %v1009_v32 = vpop.permute.xlu0 %1008 }
  0xc9   :  { %545 = vmatprep.subr.mxu1 %v274_v33  ;;  %1411 = vmatmul.mubr.msk.f32.gmra.mxu1 %vm279_vm0, %v39_v24 }
  0xca   :  { %546 = vmatpush1.msra.mxu1 %v273_v1  ;;  %581 = vmatprep.mubr.f32.mxu1 %v1520_v18 }
  0xcb   :  { %547 = vmatprep.subr.mxu1 %v272_v34  ;;  %510 = vmatprep.mubr.f32.mxu0 %v1520_v18 }
  0xcc   :  { %548 = vmatpush1.msra.mxu1 %v271_v55  ;;  %1413 = vmatmul.mubr.msk.f32.gmra.mxu0 %vm279_vm0, %v39_v24 }
  0xcd   :  { %1414 = vmatmul.mubr.msk.f32.vlgmr.msra.gmra.mxu1 %vm279_vm0, %v38_v35  ;;  %709 = vmatprep.mubr.f32.mxu0 %v1520_v18 }
  0xce   :  { %587 = vmatprep.mubr.f32.mxu1 %v1520_v18 }
  0xd1   :  { %1415 = vmatmul.mubr.msk.f32.gmra.mxu1 %vm279_vm0, %v39_v24 }
  0xd2   :  { %798 = vmatprep.mubr.f32.mxu1 %v1520_v18 }
 0x17d   :  { %v352_v26 = vpop.f32.mrf.mxu0 }
 0x17e   :  { %v604_v37 = vadd.f32 %v597_v17, %v352_v26 }
 0x17f   :  { %v354_v36 = vpop.f32.mrf.mxu0 }
 0x180   :  { %v605_v44 = vadd.f32 %v597_v17, %v354_v36 }
 0x182   :  { %v358_v46 = vpop.f32.mrf.mxu0  ;;  %1471 = vtanh.f32 %v605_v44 }
 0x183   :  { %v606_v47 = vadd.f32 %v602_v45, %v358_v46  ;;  %1473 = vtanh.f32 %v604_v37 }
 0x184   :  { %v360_v48 = vpop.f32.mrf.mxu0 }
 0x185   :  { %1475 = vtanh.f32 %v606_v47  ;;  %v607_v40 = vadd.f32 %v602_v45, %v360_v48  ;;  %v429_v49 = vpop.f32.mrf.mxu1 }
 0x187   :  { %1477 = vtanh.f32 %v607_v40  ;;  %v431_v41 = vpop.f32.mrf.mxu1 }
 0x188   :  { %v506_v53 = vpop.f32.mrf.mxu0 }
 0x189   :  { %v435_v38 = vpop.f32.mrf.mxu1 }
 0x18a   :  { %v508_v54 = vpop.f32.mrf.mxu0 }
 0x18b   :  { %v437_v39 = vpop.f32.mrf.mxu1 }
 0x18c   :  { %v512_v58 = vpop.f32.mrf.mxu0 }
 0x18d   :  { %v583_v56 = vpop.f32.mrf.mxu1 }
 0x18e   :  { %v514_v3 = vpop.f32.mrf.mxu0 }
 0x18f   :  { %v1472_v57 = vpop.eup %1471  ;;  %v585_v61 = vpop.f32.mrf.mxu1 }
 0x190   :  { %v1474_v51 = vpop.eup %1473  ;;  %v613_v59 = vmul.f32 %v1472_v57, %v1472_v57 }
 0x191   :  { %v612_v63 = vmul.f32 %v1474_v51, %v1474_v51  ;;  %v589_v7 = vpop.f32.mrf.mxu1 }
 0x192   :  { %v1476_v52 = vpop.eup %1475  ;;  %v617_v5 = vsub.f32 1.0, %v613_v59 }
 0x193   :  { %v614_v60 = vmul.f32 %v1476_v52, %v1476_v52  ;;  %v616_v8 = vsub.f32 1.0, %v612_v63  ;;  %v591_v13 = vpop.f32.mrf.mxu1 }
 0x194   :  { %v1478_v62 = vpop.eup %1477  ;;  %v621_v20 = vmul.f32 %v617_v5, %v431_v41  ;;  %v625_v15 = vmul.f32 %v617_v5, %v508_v54  ;;  %v629_v42 = vmul.f32 %v617_v5, %v585_v61 }
 0x195   :  { %v615_v0 = vmul.f32 %v1478_v62, %v1478_v62  ;;  %673 = vmatprep.subr.mxu0 %v1478_v62  ;;  %v618_v2 = vsub.f32 1.0, %v614_v60  ;;  %v620_v14 = vmul.f32 %v616_v8, %v429_v49  ;;  %v624_v16 = vmul.f32 %v616_v8, %v506_v53 }
 0x196   :  { %674 = vmatpush1.msra.mxu0 %v1476_v52  ;;  %v628_v24 = vmul.f32 %v616_v8, %v583_v56 }
 0x197   :  { %v619_v6 = vsub.f32 1.0, %v615_v0  ;;  %675 = vmatprep.subr.mxu0 %v1472_v57  ;;  %v622_v11 = vmul.f32 %v618_v2, %v435_v38  ;;  %v626_v35 = vmul.f32 %v618_v2, %v512_v58  ;;  %v630_v23 = vmul.f32 %v618_v2, %v589_v7 }
 0x198   :  { %676 = vmatpush1.msra.mxu0 %v1474_v51 }
 0x199   :  { %v623_v9 = vmul.f32 %v619_v6, %v437_v39  ;;  %v627_v10 = vmul.f32 %v619_v6, %v514_v3  ;;  %1416 = vmatmul.mubr.msk.f32.vlgmr.msra.gmra.mxu0 %vm632_vm1, %v40_v4  ;;  %v631_v19 = vmul.f32 %v619_v6, %v591_v13 }
 0x19a   :  { %715 = vmatprep.mubr.f32.mxu0 %v1520_v18 }
 0x19b   :  { %762 = vmatprep.subr.mxu1 %v623_v9  ;;  %851 = vmatprep.subr.mxu0 %v627_v10 }
 0x19c   :  { %763 = vmatpush1.msra.mxu1 %v622_v11  ;;  %852 = vmatpush1.msra.mxu0 %v626_v35 }
 0x19d   :  { %1417 = vmatmul.mubr.msk.f32.gmra.mxu0 %vm632_vm1, %v41_v12  ;;  %764 = vmatprep.subr.mxu1 %v621_v20 }
 0x19e   :  { %853 = vmatprep.subr.mxu0 %v625_v15  ;;  %765 = vmatpush1.msra.mxu1 %v620_v14 }
 0x19f   :  { %854 = vmatpush1.msra.mxu0 %v624_v16  ;;  %1420 = vmatmul.mubr.msk.f32.vlgmr.msra.gmra.mxu1 %vm632_vm1, %v40_v4 }
 0x1a0   :  { %940 = vmatprep.subr.mxu1 %v631_v19  ;;  %721 = vmatprep.mubr.f32.mxu0 %v1520_v18 }
 0x1a1   :  { %941 = vmatpush1.msra.mxu1 %v630_v23  ;;  %1418 = vmatmul.mubr.msk.f32.gmra.mxu0 %vm632_vm1, %v42_v22 }
 0x1a2   :  { %942 = vmatprep.subr.mxu1 %v629_v42  ;;  %804 = vmatprep.mubr.f32.mxu1 %v1520_v18 }
 0x1a3   :  { %943 = vmatpush1.msra.mxu1 %v628_v24  ;;  %727 = vmatprep.mubr.f32.mxu0 %v1520_v18 }
 0x1a4   :  { %1421 = vmatmul.mubr.msk.f32.gmra.mxu1 %vm632_vm1, %v41_v12 }
 0x1a5   :  { %1419 = vmatmul.mubr.msk.f32.gmra.mxu0 %vm632_vm1, %v43_v27  ;;  %810 = vmatprep.mubr.f32.mxu1 %v1520_v18 }
 0x1a6   :  { %887 = vmatprep.mubr.f32.mxu0 %v1520_v18 }
 0x1a8   :  { %1422 = vmatmul.mubr.msk.f32.gmra.mxu1 %vm632_vm1, %v42_v22 }
 0x1a9   :  { %816 = vmatprep.mubr.f32.mxu1 %v1520_v18  ;;  %1424 = vmatmul.mubr.msk.f32.vlgmr.msra.gmra.mxu0 %vm632_vm1, %v40_v4 }
 0x1aa   :  { %893 = vmatprep.mubr.f32.mxu0 %v1520_v18 }
 0x1ac   :  { %1423 = vmatmul.mubr.msk.f32.gmra.mxu1 %vm632_vm1, %v43_v27 }
 0x1ad   :  { %976 = vmatprep.mubr.f32.mxu1 %v1520_v18  ;;  %1425 = vmatmul.mubr.msk.f32.gmra.mxu0 %vm632_vm1, %v41_v12 }
 0x1ae   :  { %899 = vmatprep.mubr.f32.mxu0 %v1520_v18 }
 0x1b0   :  { %1428 = vmatmul.mubr.msk.f32.vlgmr.msra.gmra.mxu1 %vm632_vm1, %v40_v4 }
 0x1b1   :  { %982 = vmatprep.mubr.f32.mxu1 %v1520_v18  ;;  %1426 = vmatmul.mubr.msk.f32.gmra.mxu0 %vm632_vm1, %v42_v22 }
 0x1b2   :  { %905 = vmatprep.mubr.f32.mxu0 %v1520_v18 }
 0x1b4   :  { %1429 = vmatmul.mubr.msk.f32.gmra.mxu1 %vm632_vm1, %v41_v12 }
 0x1b5   :  { %988 = vmatprep.mubr.f32.mxu1 %v1520_v18  ;;  %1427 = vmatmul.mubr.msk.f32.gmra.mxu0 %vm632_vm1, %v43_v27 }
 0x1b6   :  { %1144 = vmatprep.mubr.f32.mxu0 %v1520_v18 }
 0x1b8   :  { %1430 = vmatmul.mubr.msk.f32.gmra.mxu1 %vm632_vm1, %v42_v22 }
 0x1b9   :  { %994 = vmatprep.mubr.f32.mxu1 %v1520_v18 }
 0x1bc   :  { %1431 = vmatmul.mubr.msk.f32.gmra.mxu1 %vm632_vm1, %v43_v27 }
 0x1bd   :  { %1215 = vmatprep.mubr.f32.mxu1 %v1520_v18 }
 0x259   :  { %v711_v21 = vpop.f32.mrf.mxu0 }
 0x25a   :  { %v1021_v48 = vadd.f32 %v1004_v31, %v711_v21 }
 0x25b   :  { %v713_v25 = vpop.f32.mrf.mxu0 }
 0x25c   :  { %v1022_v33 = vadd.f32 %v1004_v31, %v713_v25  ;;  %v44_v25 = vld [vmem:[%s1824_s7] sm:$0xf]  ;;  %s1521_s7 = smov [#allocation2]  }
 0x25d   :  { %v717_v30 = vpop.f32.mrf.mxu0  ;;  %s1397_s25 = sshll.u32 %s1521_s7, 4  ;;  %s1398_s25 = int_to_ptr.vmem [resolvable:$true] %s1397_s25 }
 0x25e   :  { %1479 = vtanh.f32 %v1022_v33  ;;  %v1023_v44 = vadd.f32 %v1009_v32, %v717_v30  ;;  %s1495_s26 = scalar_lea.vmem %s1398_s25, 512  ;;  %p1500_p1 = scmp.lt.s32.totalorder %s1398_s25, %s1398_s25 }
 0x25f   :  { %v719_v50 = vpop.f32.mrf.mxu0  ;;  %v1762_v43 = vpop.f32.mrf.mxu1  ;;  %p1496_p0 = scmp.ne.s32.totalorder %s1398_s25, %s1495_s26  ;;  %p1501_p2 = scmp.lt.s32.totalorder %s1495_s26, %s1495_s26 }
 0x260   :  { %v1024_v1 = vadd.f32 %v1009_v32, %v719_v50 }
 0x261   :  { %v723_v34 = vpop.f32.mrf.mxu0  ;;  %v1764_v55 = vpop.f32.mrf.mxu1  ;;  %p1502_p3 = por %p1501_p2, %p1500_p1 }
 0x262   :  { %v1025_v26 = vadd.f32 %v1014_v28, %v723_v34  ;;  %1481 = vtanh.f32 %v1024_v1 }
 0x263   :  { %v725_v17 = vpop.f32.mrf.mxu0  ;;  %p1503_p4 = pnand %p1502_p3, %p1496_p0 }
 0x264   :  { %v1026_v36 = vadd.f32 %v1014_v28, %v725_v17  ;;  %v1766_v37 = vpop.f32.mrf.mxu1 }
 0x265   :  { %v729_v45 = vpop.f32.mrf.mxu0 }
 0x266   :  { %1483 = vtanh.f32 %v1026_v36  ;;  %v1027_v46 = vadd.f32 %v1019_v29, %v729_v45  ;;  %v1768_v47 = vpop.f32.mrf.mxu1 }
 0x267   :  { %1485 = vtanh.f32 %v1025_v26  ;;  %v731_v40 = vpop.f32.mrf.mxu0 }
 0x268   :  { %1487 = vtanh.f32 %v1027_v46  ;;  %v1028_v49 = vadd.f32 %v1019_v29, %v731_v40  ;;  %v812_v41 = vpop.f32.mrf.mxu1 }
 0x269   :  { %1489 = vtanh.f32 %v1023_v44  ;;  %v1770_v38 = vpop.f32.mrf.mxu0 }
 0x26a   :  { %1491 = vtanh.f32 %v1028_v49  ;;  %v814_v53 = vpop.f32.mrf.mxu1 }
 0x26b   :  { %1493 = vtanh.f32 %v1021_v48  ;;  %v1772_v39 = vpop.f32.mrf.mxu0  ;;  %v1480_v58 = vpop.eup %1479 }
 0x26c   :  { %v818_v54 = vpop.f32.mrf.mxu1  ;;  %v1038_v15 = vmul.f32 %v1480_v58, %v1480_v58 }
 0x26d   :  { %v1774_v56 = vpop.f32.mrf.mxu0 }
 0x26e   :  { %v820_v57 = vpop.f32.mrf.mxu1  ;;  %v1046_v30 = vsub.f32 1.0, %v1038_v15 }
 0x26f   :  { %v1776_v51 = vpop.f32.mrf.mxu0  ;;  %v1482_v60 = vpop.eup %1481 }
 0x270   :  { %v1778_v52 = vpop.f32.mrf.mxu1  ;;  %v1040_v11 = vmul.f32 %v1482_v60, %v1482_v60  ;;  %v1054_v44 = vmul.f32 %v1046_v30, %v1764_v55 }
 0x271   :  { %v901_v59 = vpop.f32.mrf.mxu0 }
 0x272   :  { %v1780_v61 = vpop.f32.mrf.mxu1  ;;  %v1048_v24 = vsub.f32 1.0, %v1040_v11 }
 0x273   :  { %v1484_v62 = vpop.eup %1483  ;;  %v903_v2 = vpop.f32.mrf.mxu0 }
 0x274   :  { %v1486_v63 = vpop.eup %1485  ;;  %v1782_v0 = vpop.f32.mrf.mxu1  ;;  %v1042_v5 = vmul.f32 %v1484_v62, %v1484_v62  ;;  %v1056_v34 = vmul.f32 %v1048_v24, %v1768_v47  ;;  %v1064_v40 = vmul.f32 %v1048_v24, %v1776_v51 }
 0x275   :  { %v1488_v3 = vpop.eup %1487  ;;  %v1041_v9 = vmul.f32 %v1486_v63, %v1486_v63  ;;  %v907_v20 = vpop.f32.mrf.mxu0 }
 0x276   :  { %v1490_v4 = vpop.eup %1489  ;;  %v1043_v6 = vmul.f32 %v1488_v3, %v1488_v3  ;;  %v1784_v7 = vpop.f32.mrf.mxu1  ;;  %v1050_v16 = vsub.f32 1.0, %v1042_v5 }
 0x277   :  { %v1492_v8 = vpop.eup %1491  ;;  %v1039_v13 = vmul.f32 %v1490_v4, %v1490_v4  ;;  %v1049_v42 = vsub.f32 1.0, %v1041_v9  ;;  %v909_v28 = vpop.f32.mrf.mxu0 }
 0x278   :  { %v1494_v10 = vpop.eup %1493  ;;  %v1044_v35 = vmul.f32 %v1492_v8, %v1492_v8  ;;  %v1786_v12 = vpop.f32.mrf.mxu1  ;;  %1104 = vmatprep.subr.mxu0 %v1492_v8  ;;  %v1051_v14 = vsub.f32 1.0, %v1043_v6  ;;  %v1058_v31 = vmul.f32 %v1050_v16, %v814_v53  ;;  %v1066_v36 = vmul.f32 %v1050_v16, %v903_v2 }
 0x279   :  { %1105 = vmatpush1.msra.mxu0 %v1488_v3  ;;  %v1037_v23 = vmul.f32 %v1494_v10, %v1494_v10  ;;  %v1047_v21 = vsub.f32 1.0, %v1039_v13  ;;  %v1057_v33 = vmul.f32 %v1049_v42, %v812_v41  ;;  %v1065_v45 = vmul.f32 %v1049_v42, %v901_v59  ;;  %v1367_v51 = vpop.permute.xlu0 %1366 }
 0x27a   :  { %v1052_v19 = vsub.f32 1.0, %v1044_v35  ;;  %v992_v22 = vpop.f32.mrf.mxu1  ;;  %1106 = vmatprep.subr.mxu0 %v1484_v62  ;;  %v1059_v29 = vmul.f32 %v1051_v14, %v818_v54  ;;  %v1067_v26 = vmul.f32 %v1051_v14, %v907_v20  ;;  %v1073_v53 = vmul.f32 %v1049_v42, %v1786_v12 }
 0x27b   :  { %1107 = vmatpush1.msra.mxu0 %v1486_v63  ;;  %v1045_v32 = vsub.f32 1.0, %v1037_v23  ;;  %v1055_v17 = vmul.f32 %v1047_v21, %v1766_v37  ;;  %v1063_v47 = vmul.f32 %v1047_v21, %v1774_v56  ;;  %v1062_v37 = vmul.f32 %v1046_v30, %v1772_v39 }
 0x27c   :  { %v1060_v27 = vmul.f32 %v1052_v19, %v820_v57  ;;  %1108 = vmatprep.subr.mxu0 %v1482_v60  ;;  %v996_v50 = vpop.f32.mrf.mxu1  ;;  %v1068_v1 = vmul.f32 %v1052_v19, %v909_v28  ;;  %v1072_v54 = vmul.f32 %v1048_v24, %v1784_v7  ;;  %v1071_v39 = vmul.f32 %v1047_v21, %v1782_v0 }
 0x27d   :  { %1109 = vmatpush1.msra.mxu0 %v1490_v4  ;;  %v1053_v48 = vmul.f32 %v1045_v32, %v1762_v43  ;;  %v1061_v55 = vmul.f32 %v1045_v32, %v1770_v38  ;;  %v1075_v41 = vmul.f32 %v1051_v14, %v996_v50  ;;  %v1074_v43 = vmul.f32 %v1050_v16, %v992_v22 }
 0x27e   :  { %1110 = vmatprep.subr.mxu0 %v1480_v58  ;;  %1175 = vmatprep.subr.mxu1 %v1060_v27  ;;  %v998_v46 = vpop.f32.mrf.mxu1  ;;  %v1070_v38 = vmul.f32 %v1046_v30, %v1780_v61  ;;  %v1069_v56 = vmul.f32 %v1045_v32, %v1778_v52 }
 0x27f   :  { %1111 = vmatpush1.msra.mxu0 %v1494_v10  ;;  %1176 = vmatpush1.msra.mxu1 %v1059_v29  ;;  %v1076_v49 = vmul.f32 %v1052_v19, %v998_v46 }
 0x280   :  { %1432 = vmatmul.mubr.msk.f32.vlgmr.msra.gmra.mxu0 %vm279_vm0, %v44_v25  ;;  %1177 = vmatprep.subr.mxu1 %v1058_v31 }
 0x281   :  { %1246 = vmatprep.subr.mxu0 %v1068_v1  ;;  %1178 = vmatpush1.msra.mxu1 %v1057_v33 }
 0x282   :  { %1247 = vmatpush1.msra.mxu0 %v1067_v26  ;;  %1179 = vmatprep.subr.mxu1 %v1056_v34 }
 0x283   :  { %1248 = vmatprep.subr.mxu0 %v1066_v36  ;;  %1180 = vmatpush1.msra.mxu1 %v1055_v17 }
 0x284   :  { %1249 = vmatpush1.msra.mxu0 %v1065_v45  ;;  %1181 = vmatprep.subr.mxu1 %v1054_v44 }
 0x285   :  { %1250 = vmatprep.subr.mxu0 %v1064_v40  ;;  %1182 = vmatpush1.msra.mxu1 %v1053_v48 }
 0x286   :  { %1251 = vmatpush1.msra.mxu0 %v1063_v47  ;;  %1433 = vmatmul.mubr.msk.f32.vlgmr.msra.gmra.mxu1 %vm279_vm0, %v44_v25 }
 0x287   :  { %1252 = vmatprep.subr.mxu0 %v1062_v37  ;;  %1317 = vmatprep.subr.mxu1 %v1076_v49 }
 0x288   :  { %1253 = vmatpush1.msra.mxu0 %v1061_v55  ;;  %1318 = vmatpush1.msra.mxu1 %v1075_v41 }
 0x289   :  { %1319 = vmatprep.subr.mxu1 %v1074_v43  ;;  %1357 = vmatprep.mubr.f32.mxu1 %v1520_v18 }
 0x28a   :  { %1320 = vmatpush1.msra.mxu1 %v1073_v53  ;;  %1286 = vmatprep.mubr.f32.mxu0 %v1520_v18 }
 0x28b   :  { %1321 = vmatprep.subr.mxu1 %v1072_v54  ;;  %1434 = vmatmul.mubr.msk.f32.vlgmr.msra.gmra.mxu0 %vm279_vm0, %v44_v25 }
 0x28c   :  { %1322 = vmatpush1.msra.mxu1 %v1071_v39 }
 0x28d   :  { %1323 = vmatprep.subr.mxu1 %v1070_v38 }
 0x28e   :  { %1324 = vmatpush1.msra.mxu1 %v1069_v56 }
 0x28f   :  { %1435 = vmatmul.mubr.msk.f32.vlgmr.msra.gmra.mxu1 %vm279_vm0, %v44_v25 }
 0x340   :  { %v1146_v57 = vpop.f32.mrf.mxu0 }
 0x341   :  { %v1369_v60 = vadd.f32 %v1367_v51, %v1146_v57 }
 0x342   :  { %v1148_v58 = vpop.f32.mrf.mxu0 }
 0x343   :  { %v1370_v63 = vadd.f32 %v1367_v51, %v1148_v58 }
 0x346   :  { %v1217_v59 = vpop.f32.mrf.mxu1 }
 0x347   :  { %v1373_v62 = vrot.slane %v1217_v59, 4 }
 0x348   :  { %v1219_v18 = vpop.f32.mrf.mxu1 }
 0x349   :  { %v1384_v61 = vsel %vm1383_vm2, %v1369_v60, %v1373_v62  ;;  %v1374_v0 = vrot.slane %v1219_v18, 4 }
 0x34a   :  { %1388 = vst [vmem:[#allocation2] sm:$0xff] %v1384_v61 }
 0x34b   :  { %v1385_v52 = vsel %vm1383_vm2, %v1370_v63, %v1374_v0  ;;  %v1288_v3 = vpop.f32.mrf.mxu0 }
 0x34c   :  { %1389 = vst [vmem:[#allocation2 + $0x8] sm:$0xff] %v1385_v52 }
 0x34d   :  { %v1290_v8 = vpop.f32.mrf.mxu0 }
 0x34f   :  { %v1359_v2 = vpop.f32.mrf.mxu1 }
 0x350   :  { %v1379_v4 = vrot.slane %v1359_v2, 4 }
 0x351   :  { %v1361_v5 = vpop.f32.mrf.mxu1 }
 0x352   :  { %v1386_v6 = vsel %vm1383_vm2, %v1288_v3, %v1379_v4  ;;  %v1380_v7 = vrot.slane %v1361_v5, 4 }
 0x353   :  { %1390 = vst [vmem:[#allocation2 + $0x10] sm:$0xff] %v1386_v6 }
 0x354   :  { %v1387_v9 = vsel %vm1383_vm2, %v1290_v8, %v1380_v7 }
 0x355   :  { %1391 = vst [vmem:[#allocation2 + $0x18] sm:$0xff] %v1387_v9 }
 0x356   :  { %1506 = shalt.err (!%p1503_p4)
}
 0x357   :  { %s1522_s27 = smov 256   ;;  %s1523_s28 = smov 16  }
 0x358   :  { %1403 = dma.vmem_to_hbm [thread:$0]  %s1398_s25, 512, %s1826_s9, [#allocation3], %s1522_s27, %s1522_s27, %s1523_s28  }
 0x359   :  { %1515 = dma.done.wait [#allocation3], 512  }
 0x35a   :  { %1516 = vsyncadd [#allocation3], 4294966784 }
 0x35b   :  { %1407 = vsyncpa [#allocation3], 1 }

</bundles_post_ra>
